<compile_context>
chip_gen: v7x
topology: tpu7x:2x2x1
jax: 0.10.0
libtpu: 0.0.40
codegen_flags: <defaults>
</compile_context>

<pallas_src>
import functools

import numpy as np
import jax
import jax.numpy as jnp
from jax.experimental import pallas as pl
from jax.experimental.pallas import tpu as pltpu


# ---------------------------------------------------------------------------
# Kernel bodies
# ---------------------------------------------------------------------------
def _channel_stats(x_ref, C):
    """Channel mean (f32) and channel max of a (bt, C, HWp) block.

    Reduces over C in chunks of 8 so only a (bt, <=8, HWp) f32 temporary is
    live at a time (bounds VMEM/vreg pressure when the batch block is large).
    The max is taken in the input dtype (exact for bf16), the mean in f32.
    """
    s = None
    m = None
    for c0 in range(0, C, 8):
        c1 = min(C, c0 + 8)
        xc = x_ref[:, c0:c1, :]                        # (bt, <=8, HWp)
        sc = jnp.sum(xc.astype(jnp.float32), axis=1)   # (bt, HWp)
        mc = jnp.max(xc, axis=1).astype(jnp.float32)   # (bt, HWp)
        s = sc if s is None else s + sc
        m = mc if m is None else jnp.maximum(m, mc)
    return s * (1.0 / C), m


def _sa_mxu_kernel(x_ref, m_ref, o_ref, *, C):
    """conv7x7([mean_c, max_c]) as two MXU matmuls against masked-circulant
    matrices (zero padding folded in on the host), then sigmoid.

    x_ref: (bt, C, HWp)   m_ref: (2, HWp, HWp)   o_ref: (bt, HWp)
    """
    avg_c, max_c = _channel_stats(x_ref, C)
    conv = jnp.dot(avg_c, m_ref[0], preferred_element_type=jnp.float32)
    conv = conv + jnp.dot(max_c, m_ref[1], preferred_element_type=jnp.float32)
    o_ref[...] = jax.nn.sigmoid(conv).astype(o_ref.dtype)


def _sa_roll_kernel(x_ref, w_ref, o_ref, *, C, W, K):
    """Fallback tap-loop path (for feature maps too large for the HWp^2
    circulant matrices): one XLU lane rotation + MAC per tap, with 4
    independent partial sums so the VALU is throughput- not latency-bound.

    x_ref: (bt, C, HWp)
    w_ref: (2*K*K, HWp)  pad-masked per-tap weight rows; rows [0, K*K) are the
                         avg-branch taps, rows [K*K, 2*K*K) the max-branch.
    o_ref: (bt, HWp)
    """
    HWp = x_ref.shape[2]
    pad = K // 2
    n_acc = 4

    avg_c, max_c = _channel_stats(x_ref, C)

    # TODO(synk): switch the implicit (HWp,)->(bt,HWp) weight broadcasts to
    # stride-0 sublane-broadcast loads (w_ref[pl.ds(t, bt, stride=0), :]) once
    # stride-0 Slices are available on the deployed JAX version.
    accs = [None] * n_acc
    for t in range(K * K):
        ky, kx = divmod(t, K)
        d = (ky - pad) * W + (kx - pad)       # flattened tap offset
        shift = (-d) % HWp                    # jnp.roll-style shift amount
        ra = avg_c if shift == 0 else pltpu.roll(avg_c, shift, axis=1)
        rm = max_c if shift == 0 else pltpu.roll(max_c, shift, axis=1)
        # Per-tap weight rows already fold the zero-padding validity mask, so
        # wrapped / padded lanes contribute exactly zero.
        term = w_ref[t] * ra + w_ref[K * K + t] * rm
        g = t % n_acc
        accs[g] = term if accs[g] is None else accs[g] + term

    conv = accs[0]
    for g in range(1, n_acc):
        if accs[g] is not None:
            conv = conv + accs[g]
    o_ref[...] = jax.nn.sigmoid(conv).astype(o_ref.dtype)


# ---------------------------------------------------------------------------
# Host-side wrapper
# ---------------------------------------------------------------------------
def _pick_block_b(B, bytes_per_item, *, target_bytes=2 << 20):
    """Largest batch block whose x slab stays within the per-step byte budget.

    Prefers >= 2 grid steps only once blocks are >= 1 MiB (v7x megacore), and
    multiples of 8 (full-sublane output stores) when nearly as large.  Always
    returns a divisor of B, so ragged batches never assert.
    """
    divisors = [d for d in range(1, B + 1) if B % d == 0]
    cap = max(1, target_bytes // max(1, bytes_per_item))
    fits = [d for d in divisors if d <= cap] or [1]
    best = fits[-1]
    multi = [d for d in fits if B // d >= 2 and d * bytes_per_item >= (1 << 20)]
    if multi:
        best = multi[-1]
    mult8 = [d for d in fits if d % 8 == 0 and d <= best]
    if mult8 and mult8[-1] * 2 >= best:
        best = mult8[-1]
    return best


def spatial_attention(x, w_sp, *, kernel_size=7, block_b=None, use_mxu=None):
    """Pallas TPU forward of the PyTorch SpatialAttention module.

    x:    (B, C, H, W)
    w_sp: (1, 2, K, K) or (2, K, K) Conv2d(2, 1, K, bias=False) weight (OIHW).
    Returns sigmoid(conv_KxK([mean_c(x), max_c(x)])) with shape (B, 1, H, W).
    """
    B, C, H, W = x.shape
    K = kernel_size
    pad = K // 2
    HW = H * W
    HWp = ((HW + 127) // 128) * 128           # lane-density guard

    if use_mxu is None:
        # Both (HWp, HWp) matrices (double-buffered) must fit comfortably in
        # scoped VMEM on every generation; otherwise take the roll/MAC path.
        use_mxu = 2 * HWp * HWp * 4 <= (4 << 20)

    if block_b is None:
        block_b = _pick_block_b(B, C * HWp * x.dtype.itemsize)
    assert B % block_b == 0

    # ---- Host precompute: fold conv weights + zero-padding validity into
    # either dense masked-circulant matrices (MXU path) or per-tap weight rows
    # (roll path), both on the 128-padded flattened plane.
    w_np = np.asarray(w_sp, dtype=np.float32).reshape(2, K, K)
    ys, xs = np.meshgrid(np.arange(H), np.arange(W), indexing="ij")
    p_out = (ys * W + xs).ravel()

    x3 = x.reshape(B, C, HW)
    if HWp != HW:
        x3 = jnp.pad(x3, ((0, 0), (0, 0), (0, HWp - HW)))

    grid = (B // block_b,)
    x_spec = pl.BlockSpec((block_b, C, HWp), lambda b: (b, 0, 0))
    out_spec = pl.BlockSpec((block_b, HWp), lambda b: (b, 0))
    out_shape = jax.ShapeDtypeStruct((B, HWp), x.dtype)
    cparams = pltpu.CompilerParams(dimension_semantics=("parallel",))

    if use_mxu:
        m = np.zeros((2, HWp, HWp), np.float32)
        for ky in range(K):
            for kx in range(K):
                yy = ys + ky - pad
                xx = xs + kx - pad
                ok = ((yy >= 0) & (yy < H) & (xx >= 0) & (xx < W)).ravel()
                p_in = (np.clip(yy, 0, H - 1) * W + np.clip(xx, 0, W - 1)).ravel()
                m[0, p_in[ok], p_out[ok]] += w_np[0, ky, kx]
                m[1, p_in[ok], p_out[ok]] += w_np[1, ky, kx]
        kern = functools.partial(_sa_mxu_kernel, C=C)
        w_in = jnp.asarray(m)
        w_spec = pl.BlockSpec((2, HWp, HWp), lambda b: (0, 0, 0))
    else:
        wtap = np.zeros((2, K * K, HWp), np.float32)
        for ky in range(K):
            for kx in range(K):
                t = ky * K + kx
                yy = ys + ky - pad
                xx = xs + kx - pad
                ok = ((yy >= 0) & (yy < H) & (xx >= 0) & (xx < W)).ravel()
                wtap[0, t, :HW] = np.where(ok, w_np[0, ky, kx], 0.0)
                wtap[1, t, :HW] = np.where(ok, w_np[1, ky, kx], 0.0)
        kern = functools.partial(_sa_roll_kernel, C=C, W=W, K=K)
        w_in = jnp.asarray(wtap.reshape(2 * K * K, HWp))
        w_spec = pl.BlockSpec((2 * K * K, HWp), lambda b: (0, 0))

    out = pl.pallas_call(
        kern,
        out_shape=out_shape,
        grid=grid,
        in_specs=[x_spec, w_spec],
        out_specs=out_spec,
        compiler_params=cparams,
    )(x3, w_in)
    return out[:, :HW].reshape(B, 1, H, W)


def spatial_attention_reference(x, w_sp, *, kernel_size=7):
    """Pure-JAX reference mirroring the PyTorch forward."""
    K = kernel_size
    w = jnp.asarray(w_sp, jnp.float32).reshape(1, 2, K, K)
    avg_c = jnp.mean(x, axis=1, keepdims=True)
    max_c = jnp.max(x, axis=1, keepdims=True)
    cat = jnp.concatenate([avg_c, max_c], axis=1).astype(jnp.float32)
    conv = jax.lax.conv_general_dilated(
        cat, w, window_strides=(1, 1),
        padding=[(K // 2, K // 2), (K // 2, K // 2)],
        dimension_numbers=("NCHW", "OIHW", "NCHW"))
    return jax.nn.sigmoid(conv).astype(x.dtype)


if __name__ == "__main__":
    key = jax.random.PRNGKey(0)
    k1, k2, k3 = jax.random.split(key, 3)

    K = 7
    # Primary check: 16x16 feature map (H*W already a multiple of 128).
    B, C, H, W = 2, 16, 16, 16
    x = jax.random.normal(k1, (B, C, H, W), jnp.float32)
    # Conv2d(2, 1, 7, padding=3, bias=False) weight, PyTorch OIHW shape.
    w_sp = jax.random.normal(k2, (1, 2, K, K), jnp.float32) * 0.1

    ref = spatial_attention_reference(x, w_sp, kernel_size=K)

    # MXU (masked-circulant matmul) path -- the default at these sizes.
    out = jax.block_until_ready(spatial_attention(x, w_sp, kernel_size=K))
    assert out.shape == (B, 1, H, W)
    err = float(jnp.max(jnp.abs(out - ref)))
    # MXU f32 matmuls may run as bf16 passes at default precision; 2e-3 on a
    # sigmoid output is well inside that envelope.
    assert jnp.allclose(out, ref, rtol=2e-3, atol=2e-3), f"mxu err={err}"

    # Roll/MAC fallback path (used for large feature maps) -- exact f32 VALU.
    out_r = jax.block_until_ready(
        spatial_attention(x, w_sp, kernel_size=K, use_mxu=False))
    err_r = float(jnp.max(jnp.abs(out_r - ref)))
    assert jnp.allclose(out_r, ref, rtol=1e-4, atol=1e-4), f"roll err={err_r}"

    # Lane-padding guard: 14x14 feature map (H*W=196 -> padded to 256 lanes).
    B2, C2, H2, W2 = 2, 8, 14, 14
    x2 = jax.random.normal(k3, (B2, C2, H2, W2), jnp.float32)
    ref2 = spatial_attention_reference(x2, w_sp, kernel_size=K)
    out2 = jax.block_until_ready(spatial_attention(x2, w_sp, kernel_size=K))
    assert out2.shape == (B2, 1, H2, W2)
    err2 = float(jnp.max(jnp.abs(out2 - ref2)))
    assert jnp.allclose(out2, ref2, rtol=2e-3, atol=2e-3), f"pad err={err2}"

    print("KERNEL_OK")
</pallas_src>

<mosaic_0001>
module attributes {stable_mosaic.version = 11 : i64} {
  func.func @_sa_mxu_kernel(%arg0: i32, %arg1: memref<2x16x256xf32, #tpu.memory_space<vmem>>, %arg2: memref<2x256x256xf32, #tpu.memory_space<vmem>>, %arg3: memref<2x256xf32, #tpu.memory_space<vmem>>) attributes {dimension_semantics = [#tpu.dimension_semantics<parallel>], iteration_bounds = array<i64: 1>, scalar_prefetch = 0 : i64, scratch_operands = 0 : i64, tpu.core_type = #tpu.core_type<tc>, window_params = [{transform_indices = @transform_0, window_bounds = array<i64: 2, 16, 256>}, {pipeline_mode = #tpu.pipeline_mode<synchronous>, transform_indices = @transform_1, window_bounds = array<i64: 2, 256, 256>}, {transform_indices = @transform_2, window_bounds = array<i64: 2, 256>}]} {
    %c0 = arith.constant 0 : index
    %c0_0 = arith.constant 0 : index
    %c0_1 = arith.constant 0 : index
    %0 = vector.load %arg1[%c0, %c0_0, %c0_1] : memref<2x16x256xf32, #tpu.memory_space<vmem>>, vector<2x8x256xf32>
    %cst = arith.constant dense<0.000000e+00> : vector<2x256xf32>
    %1 = vector.multi_reduction <add>, %0, %cst [1] : vector<2x8x256xf32> to vector<2x256xf32>
    %cst_2 = arith.constant dense<0xFF800000> : vector<2x256xf32>
    %2 = vector.multi_reduction <maximumf>, %0, %cst_2 [1] : vector<2x8x256xf32> to vector<2x256xf32>
    %c0_3 = arith.constant 0 : index
    %c8 = arith.constant 8 : index
    %c0_4 = arith.constant 0 : index
    %3 = vector.load %arg1[%c0_3, %c8, %c0_4] : memref<2x16x256xf32, #tpu.memory_space<vmem>>, vector<2x8x256xf32>
    %cst_5 = arith.constant dense<0.000000e+00> : vector<2x256xf32>
    %4 = vector.multi_reduction <add>, %3, %cst_5 [1] : vector<2x8x256xf32> to vector<2x256xf32>
    %cst_6 = arith.constant dense<0xFF800000> : vector<2x256xf32>
    %5 = vector.multi_reduction <maximumf>, %3, %cst_6 [1] : vector<2x8x256xf32> to vector<2x256xf32>
    %6 = arith.addf %1, %4 : vector<2x256xf32>
    %7 = arith.maximumf %2, %5 : vector<2x256xf32>
    %cst_7 = arith.constant 6.250000e-02 : f32
    %8 = vector.broadcast %cst_7 : f32 to vector<2x256xf32>
    %9 = arith.mulf %6, %8 : vector<2x256xf32>
    %c0_8 = arith.constant 0 : index
    %c0_9 = arith.constant 0 : index
    %c0_10 = arith.constant 0 : index
    %10 = vector.load %arg2[%c0_8, %c0_9, %c0_10] : memref<2x256x256xf32, #tpu.memory_space<vmem>>, vector<1x256x256xf32>
    %11 = vector.shape_cast %10 : vector<1x256x256xf32> to vector<256x256xf32>
    %cst_11 = arith.constant dense<0.000000e+00> : vector<2x256xf32>
    %12 = tpu.matmul %9, %11, %cst_11 {dimension_numbers = #tpu.dot_dimension_numbers<[1], [0], [0], [1], [0, 0, 1, 1], [], []>} : vector<2x256xf32>, vector<256x256xf32>, vector<2x256xf32> -> vector<2x256xf32>
    %c1 = arith.constant 1 : index
    %c0_12 = arith.constant 0 : index
    %c0_13 = arith.constant 0 : index
    %13 = vector.load %arg2[%c1, %c0_12, %c0_13] : memref<2x256x256xf32, #tpu.memory_space<vmem>>, vector<1x256x256xf32>
    %14 = vector.shape_cast %13 : vector<1x256x256xf32> to vector<256x256xf32>
    %cst_14 = arith.constant dense<0.000000e+00> : vector<2x256xf32>
    %15 = tpu.matmul %7, %14, %cst_14 {dimension_numbers = #tpu.dot_dimension_numbers<[1], [0], [0], [1], [0, 0, 1, 1], [], []>} : vector<2x256xf32>, vector<256x256xf32>, vector<2x256xf32> -> vector<2x256xf32>
    %16 = arith.addf %12, %15 : vector<2x256xf32>
    %17 = arith.negf %16 : vector<2x256xf32>
    %18 = math.exp %17 : vector<2x256xf32>
    %cst_15 = arith.constant 1.000000e+00 : f32
    %19 = vector.broadcast %cst_15 : f32 to vector<2x256xf32>
    %20 = arith.addf %19, %18 : vector<2x256xf32>
    %21 = arith.divf %19, %20 : vector<2x256xf32>
    %c0_16 = arith.constant 0 : index
    %c0_17 = arith.constant 0 : index
    %22 = vector.load %arg3[%c0_16, %c0_17] : memref<2x256xf32, #tpu.memory_space<vmem>>, vector<2x256xf32>
    tpu.vector_store %arg3[%c0_16, %c0_17], %21 {strides = array<i32>} : memref<2x256xf32, #tpu.memory_space<vmem>>, vector<2x256xf32>,
    return
  }
  func.func @transform_0(%arg0: i32) -> (i32, i32, i32) {
    %c0_i32 = arith.constant 0 : i32
    %c0_i32_0 = arith.constant 0 : i32
    %c0_i32_1 = arith.constant 0 : i32
    return %arg0, %c0_i32, %c0_i32_0 : i32, i32, i32
  }
  func.func @transform_1(%arg0: i32) -> (i32, i32, i32) {
    %c0_i32 = arith.constant 0 : i32
    %c0_i32_0 = arith.constant 0 : i32
    %c0_i32_1 = arith.constant 0 : i32
    %c0_i32_2 = arith.constant 0 : i32
    return %c0_i32, %c0_i32_0, %c0_i32_1 : i32, i32, i32
  }
  func.func @transform_2(%arg0: i32) -> (i32, i32) {
    %c0_i32 = arith.constant 0 : i32
    %c0_i32_0 = arith.constant 0 : i32
    return %arg0, %c0_i32 : i32, i32
  }
}

</mosaic_0001>

<bundles_post_ra>
// kernel: tpu_custom_call.1
= control target key start
LH: loop header
LB: loop body
LE: loop exit
PB: predicated region body
PF: predicated region fallthrough
CT: control target
= control target key end

     0   :  { %7 = vsyncpa [#allocation3], 0  ;;  %s987_s0 = inlined_call_operand.hbm [shape: f32[2,16,256], index: 0, kind: input, shape index: {}]   ;;  %s988_s1 = inlined_call_operand.hbm [shape: f32[2,256,256], index: 1, kind: input, shape index: {}]   ;;  %s989_s2 = inlined_call_operand.hbm [shape: f32[2,256], index: 2, kind: output, shape index: {}]  }
   0x1   :  { %8 = vsyncpa [#allocation6], 0 }
   0x2   :  { %9 = vsyncpa [#allocation4], 0  ;;  %s702_s9 = smov [#allocation2]   ;;  %s630_s13 = scalar_lea.hbm %s987_s0, 1024 }
   0x3   :  { %s15_s10 = sshll.u32 %s702_s9, 4  ;;  %p631_p0 = scmp.ne.s32.totalorder %s987_s0, %s630_s13  ;;  %s16_s10 = int_to_ptr.vmem [resolvable:$true] %s15_s10 }
   0x4   :  { %p634_p1 = scmp.lt.u32.totalorder %s630_s13, %s987_s0 }
   0x6   :  { %p636_p2 = pnand %p634_p1, %p631_p0 }
   0x8   :  { %639 = shalt.err (!%p636_p2)
}
   0x9   :  { %s640_s18 = scalar_lea.vmem %s16_s10, 1024  ;;  %p645_p4 = scmp.lt.s32.totalorder %s16_s10, %s16_s10 }
   0xa   :  { %p641_p3 = scmp.ne.s32.totalorder %s16_s10, %s640_s18  ;;  %p646_p5 = scmp.lt.s32.totalorder %s640_s18, %s640_s18 }
   0xc   :  { %p647_p6 = por %p646_p5, %p645_p4 }
   0xe   :  { %p648_p7 = pnand %p647_p6, %p641_p3 }
  0x10   :  { %651 = shalt.err (!%p648_p7)
}
  0x11   :  { %s703_s19 = smov 256   ;;  %s704_s20 = smov 16  }
  0x12   :  { %21 = dma.hbm_to_vmem [thread:$0]  %s987_s0, 1024, %s16_s10, [#allocation3], %s703_s19, %s703_s19, %s704_s20  }
  0x13   :  { %s705_s23 = smov [#allocation5]   ;;  %s652_s27 = scalar_lea.hbm %s988_s1, 16384 }
  0x14   :  { %s27_s24 = sshll.u32 %s705_s23, 4  ;;  %p653_p8 = scmp.ne.s32.totalorder %s988_s1, %s652_s27  ;;  %s28_s24 = int_to_ptr.vmem [resolvable:$true] %s27_s24 }
  0x15   :  { %p656_p9 = scmp.lt.u32.totalorder %s652_s27, %s988_s1 }
  0x17   :  { %p658_p10 = pnand %p656_p9, %p653_p8 }
  0x19   :  { %661 = shalt.err (!%p658_p10)
}
  0x1a   :  { %s662_s4 = scalar_lea.vmem %s28_s24, 16384  ;;  %p667_p12 = scmp.lt.s32.totalorder %s28_s24, %s28_s24 }
  0x1b   :  { %p663_p11 = scmp.ne.s32.totalorder %s28_s24, %s662_s4  ;;  %p668_p13 = scmp.lt.s32.totalorder %s662_s4, %s662_s4 }
  0x1d   :  { %p669_p0 = por %p668_p13, %p667_p12 }
  0x1f   :  { %p670_p1 = pnand %p669_p0, %p663_p11 }
  0x21   :  { %673 = shalt.err (!%p670_p1)
}
  0x22   :  { %33 = dma.hbm_to_vmem [thread:$0]  %s988_s1, 16384, %s28_s24, [#allocation6], %s703_s19, %s703_s19, %s704_s20  }
  0x23   :  { %696 = dma.done.wait [#allocation3], 1024  }
  0x24   :  { %697 = vsyncadd [#allocation3], 4294966272 }
  0x25   :  { %698 = dma.done.wait [#allocation6], 16384  }
  0x26   :  { %699 = vsyncadd [#allocation6], 4294950912  ;;  %v222_v0 = vld [vmem:[#allocation5 + $0x208] sm:$0xff]  ;;  %v224_v1 = vld [vmem:[#allocation5 + $0x218] sm:$0xff]  ;;  %vm289_vm0 = vcmask 1041409   ;;  %s706_s1 = smov [#allocation7]  }
  0x27   :  { %v157_v2 = vld [vmem:[#allocation5 + $0x8] sm:$0xff]  ;;  %v487_v3 = vpack.c.bf16 %v224_v1, %v222_v0  ;;  %v159_v4 = vld [vmem:[#allocation5 + $0x18] sm:$0xff]  ;;  %v221_v5 = vld [vmem:[#allocation5 + $0x200] sm:$0xff]  ;;  %s474_s6 = sshll.u32 %s706_s1, 4  ;;  %s475_s6 = int_to_ptr.vmem [resolvable:$true] %s474_s6 }
  0x28   :  { %v223_v6 = vld [vmem:[#allocation5 + $0x210] sm:$0xff]  ;;  %v551_v7 = vpack.c.bf16 %v159_v4, %v157_v2  ;;  %v156_v9 = vld [vmem:[#allocation5] sm:$0xff]  ;;  %v226_v11 = vld [vmem:[#allocation5 + $0x228] sm:$0xff]  ;;  %s674_s7 = scalar_lea.vmem %s475_s6, 64  ;;  %p679_p3 = scmp.lt.s32.totalorder %s475_s6, %s475_s6 }
  0x29   :  { %v489_v8 = vpack.c.bf16 %v223_v6, %v221_v5  ;;  %v158_v10 = vld [vmem:[#allocation5 + $0x10] sm:$0xff]  ;;  %488 = vmatprep.subr.bf16.mxu1 %v487_v3  ;;  %v228_v13 = vld [vmem:[#allocation5 + $0x238] sm:$0xff]  ;;  %v161_v14 = vld [vmem:[#allocation5 + $0x28] sm:$0xff]  ;;  %p675_p2 = scmp.ne.s32.totalorder %s475_s6, %s674_s7  ;;  %p680_p4 = scmp.lt.s32.totalorder %s674_s7, %s674_s7 }
  0x2a   :  { %v553_v12 = vpack.c.bf16 %v158_v10, %v156_v9  ;;  %v163_v15 = vld [vmem:[#allocation5 + $0x38] sm:$0xff]  ;;  %552 = vmatprep.subr.bf16.mxu0 %v551_v7  ;;  %v491_v16 = vpack.c.bf16 %v228_v13, %v226_v11  ;;  %v225_v18 = vld [vmem:[#allocation5 + $0x220] sm:$0xff]  ;;  %v227_v19 = vld [vmem:[#allocation5 + $0x230] sm:$0xff] }
  0x2b   :  { %490 = vmatpush1.bf16.msra.mxu1 %v489_v8  ;;  %v555_v17 = vpack.c.bf16 %v163_v15, %v161_v14  ;;  %v160_v20 = vld [vmem:[#allocation5 + $0x20] sm:$0xff]  ;;  %v493_v21 = vpack.c.bf16 %v227_v19, %v225_v18  ;;  %v162_v22 = vld [vmem:[#allocation5 + $0x30] sm:$0xff]  ;;  %v230_v23 = vld [vmem:[#allocation5 + $0x248] sm:$0xff]  ;;  %p681_p5 = por %p680_p4, %p679_p3 }
  0x2c   :  { %554 = vmatpush1.bf16.msra.mxu0 %v553_v12  ;;  %v232_v24 = vld [vmem:[#allocation5 + $0x258] sm:$0xff]  ;;  %492 = vmatprep.subr.bf16.mxu1 %v491_v16  ;;  %v557_v25 = vpack.c.bf16 %v162_v22, %v160_v20  ;;  %v165_v27 = vld [vmem:[#allocation5 + $0x48] sm:$0xff]  ;;  %v229_v29 = vld [vmem:[#allocation5 + $0x240] sm:$0xff] }
  0x2d   :  { %556 = vmatprep.subr.bf16.mxu0 %v555_v17  ;;  %v495_v26 = vpack.c.bf16 %v232_v24, %v230_v23  ;;  %v167_v28 = vld [vmem:[#allocation5 + $0x58] sm:$0xff]  ;;  %v231_v31 = vld [vmem:[#allocation5 + $0x250] sm:$0xff]  ;;  %v164_v32 = vld [vmem:[#allocation5 + $0x40] sm:$0xff]  ;;  %p682_p6 = pnand %p681_p5, %p675_p2 }
  0x2e   :  { %v559_v30 = vpack.c.bf16 %v167_v28, %v165_v27  ;;  %v166_v33 = vld [vmem:[#allocation5 + $0x50] sm:$0xff]  ;;  %v497_v34 = vpack.c.bf16 %v231_v31, %v229_v29  ;;  %v234_v35 = vld [vmem:[#allocation5 + $0x268] sm:$0xff]  ;;  %v236_v36 = vld [vmem:[#allocation5 + $0x278] sm:$0xff] }
  0x2f   :  { %494 = vmatpush1.bf16.msra.mxu1 %v493_v21  ;;  %v169_v37 = vld [vmem:[#allocation5 + $0x68] sm:$0xff]  ;;  %v561_v38 = vpack.c.bf16 %v166_v33, %v164_v32  ;;  %v499_v39 = vpack.c.bf16 %v236_v36, %v234_v35  ;;  %v171_v40 = vld [vmem:[#allocation5 + $0x78] sm:$0xff]  ;;  %v233_v41 = vld [vmem:[#allocation5 + $0x260] sm:$0xff] }
  0x30   :  { %558 = vmatpush1.bf16.msra.mxu0 %v557_v25  ;;  %496 = vmatprep.subr.bf16.mxu1 %v495_v26  ;;  %v235_v42 = vld [vmem:[#allocation5 + $0x270] sm:$0xff]  ;;  %v563_v43 = vpack.c.bf16 %v171_v40, %v169_v37  ;;  %v168_v44 = vld [vmem:[#allocation5 + $0x60] sm:$0xff]  ;;  %v238_v46 = vld [vmem:[#allocation5 + $0x288] sm:$0xff] }
  0x31   :  { %560 = vmatprep.subr.bf16.mxu0 %v559_v30  ;;  %v170_v45 = vld [vmem:[#allocation5 + $0x70] sm:$0xff]  ;;  %v240_v47 = vld [vmem:[#allocation5 + $0x298] sm:$0xff]  ;;  %v173_v48 = vld [vmem:[#allocation5 + $0x88] sm:$0xff]  ;;  %v501_v50 = vpack.c.bf16 %v235_v42, %v233_v41 }
  0x32   :  { %v175_v49 = vld [vmem:[#allocation5 + $0x98] sm:$0xff]  ;;  %v565_v51 = vpack.c.bf16 %v170_v45, %v168_v44  ;;  %v503_v52 = vpack.c.bf16 %v240_v47, %v238_v46  ;;  %v237_v53 = vld [vmem:[#allocation5 + $0x280] sm:$0xff]  ;;  %v239_v54 = vld [vmem:[#allocation5 + $0x290] sm:$0xff] }
  0x33   :  { %498 = vmatpush1.bf16.msra.mxu1 %v497_v34  ;;  %v172_v55 = vld [vmem:[#allocation5 + $0x80] sm:$0xff]  ;;  %v567_v56 = vpack.c.bf16 %v175_v49, %v173_v48  ;;  %v174_v57 = vld [vmem:[#allocation5 + $0x90] sm:$0xff]  ;;  %v242_v58 = vld [vmem:[#allocation5 + $0x2a8] sm:$0xff]  ;;  %v505_v62 = vpack.c.bf16 %v239_v54, %v237_v53 }
  0x34   :  { %562 = vmatpush1.bf16.msra.mxu0 %v561_v38  ;;  %500 = vmatprep.subr.bf16.mxu1 %v499_v39  ;;  %v244_v59 = vld [vmem:[#allocation5 + $0x2b8] sm:$0xff]  ;;  %v177_v60 = vld [vmem:[#allocation5 + $0xa8] sm:$0xff]  ;;  %v569_v63 = vpack.c.bf16 %v174_v57, %v172_v55  ;;  %v241_v1 = vld [vmem:[#allocation5 + $0x2a0] sm:$0xff] }
  0x35   :  { %564 = vmatprep.subr.bf16.mxu0 %v563_v43  ;;  %v179_v61 = vld [vmem:[#allocation5 + $0xb8] sm:$0xff]  ;;  %v507_v0 = vpack.c.bf16 %v244_v59, %v242_v58  ;;  %v243_v2 = vld [vmem:[#allocation5 + $0x2b0] sm:$0xff]  ;;  %v176_v3 = vld [vmem:[#allocation5 + $0xa0] sm:$0xff] }
  0x36   :  { %v571_v4 = vpack.c.bf16 %v179_v61, %v177_v60  ;;  %v178_v5 = vld [vmem:[#allocation5 + $0xb0] sm:$0xff]  ;;  %v246_v6 = vld [vmem:[#allocation5 + $0x2c8] sm:$0xff]  ;;  %v248_v7 = vld [vmem:[#allocation5 + $0x2d8] sm:$0xff]  ;;  %v509_v10 = vpack.c.bf16 %v243_v2, %v241_v1 }
  0x37   :  { %502 = vmatpush1.bf16.msra.mxu1 %v501_v50  ;;  %v181_v8 = vld [vmem:[#allocation5 + $0xc8] sm:$0xff]  ;;  %v183_v9 = vld [vmem:[#allocation5 + $0xd8] sm:$0xff]  ;;  %v573_v11 = vpack.c.bf16 %v178_v5, %v176_v3  ;;  %v511_v12 = vpack.c.bf16 %v248_v7, %v246_v6  ;;  %v245_v13 = vld [vmem:[#allocation5 + $0x2c0] sm:$0xff] }
  0x38   :  { %566 = vmatpush1.bf16.msra.mxu0 %v565_v51  ;;  %504 = vmatprep.subr.bf16.mxu1 %v503_v52  ;;  %v247_v14 = vld [vmem:[#allocation5 + $0x2d0] sm:$0xff]  ;;  %v180_v15 = vld [vmem:[#allocation5 + $0xc0] sm:$0xff]  ;;  %v575_v16 = vpack.c.bf16 %v183_v9, %v181_v8  ;;  %v250_v18 = vld [vmem:[#allocation5 + $0x2e8] sm:$0xff] }
  0x39   :  { %568 = vmatprep.subr.bf16.mxu0 %v567_v56  ;;  %v182_v17 = vld [vmem:[#allocation5 + $0xd0] sm:$0xff]  ;;  %v252_v19 = vld [vmem:[#allocation5 + $0x2f8] sm:$0xff]  ;;  %v185_v20 = vld [vmem:[#allocation5 + $0xe8] sm:$0xff]  ;;  %v513_v22 = vpack.c.bf16 %v247_v14, %v245_v13 }
  0x3a   :  { %v187_v21 = vld [vmem:[#allocation5 + $0xf8] sm:$0xff]  ;;  %v577_v23 = vpack.c.bf16 %v182_v17, %v180_v15  ;;  %v515_v24 = vpack.c.bf16 %v252_v19, %v250_v18  ;;  %v249_v25 = vld [vmem:[#allocation5 + $0x2e0] sm:$0xff]  ;;  %v251_v26 = vld [vmem:[#allocation5 + $0x2f0] sm:$0xff] }
  0x3b   :  { %506 = vmatpush1.bf16.msra.mxu1 %v505_v62  ;;  %v184_v27 = vld [vmem:[#allocation5 + $0xe0] sm:$0xff]  ;;  %v579_v28 = vpack.c.bf16 %v187_v21, %v185_v20  ;;  %v186_v29 = vld [vmem:[#allocation5 + $0xf0] sm:$0xff]  ;;  %v254_v30 = vld [vmem:[#allocation5 + $0x308] sm:$0xff]  ;;  %v517_v34 = vpack.c.bf16 %v251_v26, %v249_v25 }
  0x3c   :  { %570 = vmatpush1.bf16.msra.mxu0 %v569_v63  ;;  %508 = vmatprep.subr.bf16.mxu1 %v507_v0  ;;  %v256_v31 = vld [vmem:[#allocation5 + $0x318] sm:$0xff]  ;;  %v189_v32 = vld [vmem:[#allocation5 + $0x108] sm:$0xff]  ;;  %v253_v35 = vld [vmem:[#allocation5 + $0x300] sm:$0xff]  ;;  %v581_v36 = vpack.c.bf16 %v186_v29, %v184_v27 }
  0x3d   :  { %572 = vmatprep.subr.bf16.mxu0 %v571_v4  ;;  %v191_v33 = vld [vmem:[#allocation5 + $0x118] sm:$0xff]  ;;  %v519_v37 = vpack.c.bf16 %v256_v31, %v254_v30  ;;  %v255_v38 = vld [vmem:[#allocation5 + $0x310] sm:$0xff]  ;;  %v188_v39 = vld [vmem:[#allocation5 + $0x100] sm:$0xff] }
  0x3e   :  { %v190_v40 = vld [vmem:[#allocation5 + $0x110] sm:$0xff]  ;;  %v583_v41 = vpack.c.bf16 %v191_v33, %v189_v32  ;;  %v258_v42 = vld [vmem:[#allocation5 + $0x328] sm:$0xff]  ;;  %v260_v43 = vld [vmem:[#allocation5 + $0x338] sm:$0xff]  ;;  %v521_v48 = vpack.c.bf16 %v255_v38, %v253_v35 }
  0x3f   :  { %510 = vmatpush1.bf16.msra.mxu1 %v509_v10  ;;  %v193_v44 = vld [vmem:[#allocation5 + $0x128] sm:$0xff]  ;;  %v195_v45 = vld [vmem:[#allocation5 + $0x138] sm:$0xff]  ;;  %v746_v46 = vld [vmem:[#allocation5 + $0x320] sm:$0xff]  ;;  %v585_v53 = vpack.c.bf16 %v190_v40, %v188_v39  ;;  %v523_v54 = vpack.c.bf16 %v260_v43, %v258_v42 }
  0x40   :  { %574 = vmatpush1.bf16.msra.mxu0 %v573_v11  ;;  %512 = vmatprep.subr.bf16.mxu1 %v511_v12  ;;  %v748_v47 = vld [vmem:[#allocation5 + $0x330] sm:$0xff]  ;;  %v750_v49 = vld [vmem:[#allocation5 + $0x120] sm:$0xff]  ;;  %v754_v51 = vld [vmem:[#allocation5 + $0x348] sm:$0xff]  ;;  %v587_v63 = vpack.c.bf16 %v195_v45, %v193_v44 }
  0x41   :  { %576 = vmatprep.subr.bf16.mxu0 %v575_v16  ;;  %v752_v50 = vld [vmem:[#allocation5 + $0x130] sm:$0xff]  ;;  %v756_v52 = vld [vmem:[#allocation5 + $0x358] sm:$0xff]  ;;  %v758_v55 = vld [vmem:[#allocation5 + $0x148] sm:$0xff]  ;;  %v525_v16 = vpack.c.bf16 %v748_v47, %v746_v46 }
  0x42   :  { %v760_v56 = vld [vmem:[#allocation5 + $0x158] sm:$0xff]  ;;  %v762_v57 = vld [vmem:[#allocation5 + $0x340] sm:$0xff]  ;;  %v764_v58 = vld [vmem:[#allocation5 + $0x350] sm:$0xff] }
  0x43   :  { %514 = vmatpush1.bf16.msra.mxu1 %v513_v22  ;;  %v766_v59 = vld [vmem:[#allocation5 + $0x140] sm:$0xff]  ;;  %v768_v60 = vld [vmem:[#allocation5 + $0x150] sm:$0xff]  ;;  %v770_v61 = vld [vmem:[#allocation5 + $0x368] sm:$0xff]  ;;  %v589_v22 = vpack.c.bf16 %v752_v50, %v750_v49  ;;  %v591_v27 = vpack.c.bf16 %v760_v56, %v758_v55 }
  0x44   :  { %578 = vmatpush1.bf16.msra.mxu0 %v577_v23  ;;  %516 = vmatprep.subr.bf16.mxu1 %v515_v24  ;;  %v772_v62 = vld [vmem:[#allocation5 + $0x378] sm:$0xff]  ;;  %v774_v0 = vld [vmem:[#allocation5 + $0x168] sm:$0xff]  ;;  %v778_v2 = vld [vmem:[#allocation5 + $0x360] sm:$0xff]  ;;  %v527_v23 = vpack.c.bf16 %v756_v52, %v754_v51  ;;  %v593_v29 = vpack.c.bf16 %v768_v60, %v766_v59 }
  0x45   :  { %580 = vmatprep.subr.bf16.mxu0 %v579_v28  ;;  %v776_v1 = vld [vmem:[#allocation5 + $0x178] sm:$0xff]  ;;  %v780_v3 = vld [vmem:[#allocation5 + $0x370] sm:$0xff]  ;;  %v782_v4 = vld [vmem:[#allocation5 + $0x160] sm:$0xff]  ;;  %v529_v28 = vpack.c.bf16 %v764_v58, %v762_v57  ;;  %v531_v30 = vpack.c.bf16 %v772_v62, %v770_v61 }
  0x46   :  { %v784_v5 = vld [vmem:[#allocation5 + $0x170] sm:$0xff]  ;;  %v786_v6 = vld [vmem:[#allocation5 + $0x388] sm:$0xff]  ;;  %v788_v7 = vld [vmem:[#allocation5 + $0x398] sm:$0xff]  ;;  %v533_v35 = vpack.c.bf16 %v780_v3, %v778_v2 }
  0x47   :  { %518 = vmatpush1.bf16.msra.mxu1 %v517_v34  ;;  %v790_v8 = vld [vmem:[#allocation5 + $0x188] sm:$0xff]  ;;  %v792_v9 = vld [vmem:[#allocation5 + $0x198] sm:$0xff]  ;;  %v794_v10 = vld [vmem:[#allocation5 + $0x380] sm:$0xff]  ;;  %v595_v34 = vpack.c.bf16 %v776_v1, %v774_v0 }
  0x48   :  { %582 = vmatpush1.bf16.msra.mxu0 %v581_v36  ;;  %520 = vmatprep.subr.bf16.mxu1 %v519_v37  ;;  %v796_v11 = vld [vmem:[#allocation5 + $0x390] sm:$0xff]  ;;  %v798_v12 = vld [vmem:[#allocation5 + $0x180] sm:$0xff]  ;;  %v802_v14 = vld [vmem:[#allocation5 + $0x3a8] sm:$0xff]  ;;  %v597_v36 = vpack.c.bf16 %v784_v5, %v782_v4  ;;  %v535_v37 = vpack.c.bf16 %v788_v7, %v786_v6 }
  0x49   :  { %584 = vmatprep.subr.bf16.mxu0 %v583_v41  ;;  %v800_v13 = vld [vmem:[#allocation5 + $0x190] sm:$0xff]  ;;  %v804_v15 = vld [vmem:[#allocation5 + $0x3b8] sm:$0xff]  ;;  %v808_v17 = vld [vmem:[#allocation5 + $0x1a8] sm:$0xff]  ;;  %v991_v6 = vpack.c.bf16 %v796_v11, %v794_v10 }
  0x4a   :  { %v810_v18 = vld [vmem:[#allocation5 + $0x1b8] sm:$0xff]  ;;  %v812_v19 = vld [vmem:[#allocation5 + $0x3a0] sm:$0xff]  ;;  %v814_v20 = vld [vmem:[#allocation5 + $0x3b0] sm:$0xff] }
  0x4b   :  { %522 = vmatpush1.bf16.msra.mxu1 %v521_v48  ;;  %v816_v21 = vld [vmem:[#allocation5 + $0x1a0] sm:$0xff]  ;;  %v822_v24 = vld [vmem:[#allocation5 + $0x1b0] sm:$0xff]  ;;  %v824_v25 = vld [vmem:[#allocation5 + $0x3c8] sm:$0xff]  ;;  %v994_v10 = vpack.c.bf16 %v810_v18, %v808_v17 }
  0x4c   :  { %586 = vmatpush1.bf16.msra.mxu0 %v585_v53  ;;  %524 = vmatprep.subr.bf16.mxu1 %v523_v54  ;;  %v826_v26 = vld [vmem:[#allocation5 + $0x3d8] sm:$0xff]  ;;  %v836_v31 = vld [vmem:[#allocation5 + $0x1c8] sm:$0xff]  ;;  %v840_v33 = vld [vmem:[#allocation5 + $0x3c0] sm:$0xff] }
  0x4d   :  { %588 = vmatprep.subr.bf16.mxu0 %v587_v63  ;;  %v838_v32 = vld [vmem:[#allocation5 + $0x1d8] sm:$0xff]  ;;  %v850_v38 = vld [vmem:[#allocation5 + $0x3d0] sm:$0xff]  ;;  %v852_v39 = vld [vmem:[#allocation5 + $0x1c0] sm:$0xff] }
  0x4e   :  { %v854_v40 = vld [vmem:[#allocation5 + $0x1d0] sm:$0xff]  ;;  %v864_v45 = vld [vmem:[#allocation5 + $0x3e8] sm:$0xff]  ;;  %v866_v46 = vld [vmem:[#allocation5 + $0x3f8] sm:$0xff] }
  0x4f   :  { %526 = vmatpush1.bf16.msra.mxu1 %v525_v16  ;;  %v868_v47 = vld [vmem:[#allocation5 + $0x1e8] sm:$0xff]  ;;  %v876_v51 = vld [vmem:[#allocation5 + $0x1f8] sm:$0xff]  ;;  %v878_v52 = vld [vmem:[#allocation5 + $0x3e0] sm:$0xff] }
  0x50   :  { %590 = vmatpush1.bf16.msra.mxu0 %v589_v22  ;;  %528 = vmatprep.subr.bf16.mxu1 %v527_v23  ;;  %v880_v53 = vld [vmem:[#allocation5 + $0x3f0] sm:$0xff]  ;;  %v890_v58 = vld [vmem:[#allocation5 + $0x1e0] sm:$0xff]  ;;  %v41_v60 = vld [vmem:[#allocation2 + $0x8] sm:$0xff] }
  0x51   :  { %592 = vmatprep.subr.bf16.mxu0 %v591_v27  ;;  %v892_v59 = vld [vmem:[#allocation5 + $0x1f0] sm:$0xff]  ;;  %v43_v0 = vld [vmem:[#allocation2 + $0x28] sm:$0xff]  ;;  %v50_v1 = vrot.slane %v41_v60, 4  ;;  %v93_v2 = vld [vmem:[#allocation2 + $0x18] sm:$0xff] }
  0x52   :  { %v95_v3 = vld [vmem:[#allocation2 + $0x38] sm:$0xff]  ;;  %v62_v22 = vrot.slane %v43_v0, 4  ;;  %v102_v23 = vrot.slane %v93_v2, 4  ;;  %v902_v57 = vld [vmem:[#allocation2] sm:$0xff] }
  0x53   :  { %530 = vmatpush1.bf16.msra.mxu1 %v529_v28  ;;  %v114_v27 = vrot.slane %v95_v3, 4  ;;  %v904_v61 = vld [vmem:[#allocation2 + $0x20] sm:$0xff]  ;;  %v75_v62 = vmax.f32 %v41_v60, %v50_v1  ;;  %v51_v56 = vadd.f32 %v50_v1, %v41_v60  ;;  %v44_v63 = vrot.slane %v902_v57, 4 }
  0x54   :  { %594 = vmatpush1.bf16.msra.mxu0 %v593_v29  ;;  %532 = vmatprep.subr.bf16.mxu1 %v531_v30  ;;  %v87_v28 = vmax.f32 %v43_v0, %v62_v22  ;;  %v127_v54 = vmax.f32 %v93_v2, %v102_v23  ;;  %v63_v16 = vadd.f32 %v62_v22, %v43_v0 }
  0x55   :  { %596 = vmatprep.subr.bf16.mxu0 %v595_v34  ;;  %v139_v50 = vmax.f32 %v95_v3, %v114_v27  ;;  %v76_v49 = vrot.slane %v75_v62, 2  ;;  %v52_v48 = vrot.slane %v51_v56, 2  ;;  %v103_v44 = vadd.f32 %v102_v23, %v93_v2 }
  0x56   :  { %v115_v43 = vadd.f32 %v114_v27, %v95_v3  ;;  %v88_v42 = vrot.slane %v87_v28, 2  ;;  %v128_v29 = vrot.slane %v127_v54, 2  ;;  %v64_v41 = vrot.slane %v63_v16, 2 }
  0x57   :  { %534 = vmatpush1.bf16.msra.mxu1 %v533_v35  ;;  %v140_v30 = vrot.slane %v139_v50, 2  ;;  %v77_v34 = vmax.f32 %v75_v62, %v76_v49  ;;  %v53_v60 = vadd.f32 %v52_v48, %v51_v56  ;;  %v104_v0 = vrot.slane %v103_v44, 2  ;;  %v92_v49 = vld [vmem:[#allocation2 + $0x10] sm:$0xff] }
  0x58   :  { %598 = vmatpush1.bf16.msra.mxu0 %v597_v36  ;;  %536 = vmatprep.subr.bf16.mxu1 %v535_v37  ;;  %v116_v1 = vrot.slane %v115_v43, 2  ;;  %v990_v2 = vpack.c.bf16 %v792_v9, %v790_v8  ;;  %v89_v35 = vmax.f32 %v87_v28, %v88_v42  ;;  %v129_v3 = vmax.f32 %v127_v54, %v128_v29 }
  0x59   :  { %v141_v22 = vmax.f32 %v139_v50, %v140_v30  ;;  %v65_v23 = vadd.f32 %v64_v41, %v63_v16  ;;  %v78_v27 = vrot.slane %v77_v34, 1  ;;  %v54_v55 = vrot.slane %v53_v60, 1  ;;  %v94_v50 = vld [vmem:[#allocation2 + $0x30] sm:$0xff] }
  0x5a   :  { %600 = vmatprep.subr.bf16.mxu0 %v990_v2  ;;  %v105_v4 = vadd.f32 %v104_v0, %v103_v44  ;;  %v117_v5 = vadd.f32 %v116_v1, %v115_v43  ;;  %v90_v7 = vrot.slane %v89_v35, 1  ;;  %v130_v36 = vrot.slane %v129_v3, 1 }
  0x5b   :  { %538 = vmatpush1.bf16.msra.mxu1 %v991_v6  ;;  %v142_v37 = vrot.slane %v141_v22, 1  ;;  %v66_v48 = vrot.slane %v65_v23, 1  ;;  %v992_v8 = vpack.c.bf16 %v800_v13, %v798_v12  ;;  %v993_v9 = vpack.c.bf16 %v804_v15, %v802_v14 }
  0x5c   :  { %v79_v41 = vmax.f32 %v77_v34, %v78_v27  ;;  %v55_v42 = vadd.f32 %v54_v55, %v53_v60  ;;  %v106_v44 = vrot.slane %v105_v4, 1  ;;  %v118_v43 = vrot.slane %v117_v5, 1 }
  0x5d   :  { %602 = vmatpush1.bf16.msra.mxu0 %v992_v8  ;;  %540 = vmatprep.subr.bf16.mxu1 %v993_v9  ;;  %v91_v11 = vmax.f32 %v89_v35, %v90_v7  ;;  %v131_v54 = vmax.f32 %v129_v3, %v130_v36  ;;  %v143_v56 = vmax.f32 %v141_v22, %v142_v37  ;;  %v995_v15 = vrot.slane %v904_v61, 4 }
  0x5e   :  { %604 = vmatprep.subr.bf16.mxu0 %v994_v10  ;;  %v67_v62 = vadd.f32 %v66_v48, %v65_v23  ;;  %v107_v12 = vadd.f32 %v106_v44, %v105_v4  ;;  %v119_v13 = vadd.f32 %v118_v43, %v117_v5  ;;  %v69_v14 = vmax.f32 %v902_v57, %v44_v63 }
  0x5f   :  { %v81_v55 = vmax.f32 %v904_v61, %v995_v15  ;;  %v996_v16 = vpack.c.bf16 %v814_v20, %v812_v19  ;;  %v149_v17 = vmax.f32 %v79_v41, %v131_v54  ;;  %v151_v18 = vmax.f32 %v91_v11, %v143_v56 }
  0x60   :  { %v96_v28 = vrot.slane %v92_v49, 4  ;;  %v108_v29 = vrot.slane %v94_v50, 4  ;;  %v997_v30 = vpack.c.bf16 %v822_v24, %v816_v21  ;;  %v998_v34 = vpack.c.bf16 %v826_v26, %v824_v25 }
  0x61   :  { %542 = vmatpush1.bf16.msra.mxu1 %v996_v16  ;;  %v145_v60 = vadd.f32 %v107_v12, %v55_v42  ;;  %v147_v0 = vadd.f32 %v119_v13, %v67_v62  ;;  %v70_v1 = vrot.slane %v69_v14, 2  ;;  %v82_v2 = vrot.slane %v81_v55, 2 }
  0x62   :  { %606 = vmatpush1.bf16.msra.mxu0 %v997_v30  ;;  %544 = vmatprep.subr.bf16.mxu1 %v998_v34  ;;  %v999_v19 = vpack.c.bf16 %v838_v32, %v836_v31  ;;  %v291_v20 = vsel %vm289_vm0, %v151_v18, %v149_v17  ;;  %v121_v35 = vmax.f32 %v92_v49, %v96_v28 }
  0x63   :  { %v133_v3 = vmax.f32 %v94_v50, %v108_v29  ;;  %v45_v21 = vadd.f32 %v44_v63, %v902_v57  ;;  %358 = vmatprep.mubr.f32.mxu1 %v291_v20  ;;  %v153_v24 = vmul.f32 0.0625, %v145_v60  ;;  %v155_v25 = vmul.f32 0.0625, %v147_v0 }
  0x64   :  { %608 = vmatprep.subr.bf16.mxu0 %v999_v19  ;;  %v71_v26 = vmax.f32 %v69_v14, %v70_v1  ;;  %v83_v22 = vmax.f32 %v81_v55, %v82_v2  ;;  %v1000_v23 = vpack.c.bf16 %v850_v38, %v840_v33  ;;  %v122_v27 = vrot.slane %v121_v35, 2 }
  0x65   :  { %v134_v31 = vrot.slane %v133_v3, 2  ;;  %v46_v32 = vrot.slane %v45_v21, 2  ;;  %v1001_v4 = vmov %v995_v15  ;;  %v1002_v6 = vpack.c.bf16 %v854_v40, %v852_v39 }
  0x66   :  { %546 = vmatpush1.bf16.msra.mxu1 %v1000_v23  ;;  %v57_v5 = vadd.f32 %v1001_v4, %v904_v61  ;;  %v1003_v57 = vpack.c.bf16 %v866_v46, %v864_v45  ;;  %v370_v63 = vsel %vm289_vm0, %v155_v25, %v153_v24  ;;  %v72_v7 = vrot.slane %v71_v26, 1 }
  0x67   :  { %610 = vmatpush1.bf16.msra.mxu0 %v1002_v6  ;;  %v84_v33 = vrot.slane %v83_v22, 1  ;;  %v97_v38 = vadd.f32 %v96_v28, %v92_v49  ;;  %v1004_v36 = vpack.c.bf16 %v876_v51, %v868_v47  ;;  %437 = vmatprep.mubr.f32.mxu0 %v370_v63  ;;  %v123_v37 = vmax.f32 %v121_v35, %v122_v27 }
  0x68   :  { %548 = vmatprep.subr.bf16.mxu1 %v1003_v57  ;;  %v135_v61 = vmax.f32 %v133_v3, %v134_v31  ;;  %v47_v48 = vadd.f32 %v46_v32, %v45_v21  ;;  %v58_v8 = vrot.slane %v57_v5, 2  ;;  %v73_v39 = vmax.f32 %v71_v26, %v72_v7 }
  0x69   :  { %612 = vmatprep.subr.bf16.mxu0 %v1004_v36  ;;  %v85_v40 = vmax.f32 %v83_v22, %v84_v33  ;;  %v98_v9 = vrot.slane %v97_v38, 2  ;;  %v109_v41 = vadd.f32 %v108_v29, %v94_v50  ;;  %v1005_v45 = vpack.c.bf16 %v880_v53, %v878_v52 }
  0x6a   :  { %v124_v46 = vrot.slane %v123_v37, 1  ;;  %v136_v42 = vrot.slane %v135_v61, 1  ;;  %v48_v44 = vrot.slane %v47_v48, 1  ;;  %v59_v43 = vadd.f32 %v58_v8, %v57_v5 }
  0x6b   :  { %550 = vmatpush1.bf16.msra.mxu1 %v1005_v45  ;;  %v1006_v47 = vpack.c.bf16 %v892_v59, %v890_v58  ;;  %v99_v51 = vadd.f32 %v98_v9, %v97_v38  ;;  %v110_v49 = vrot.slane %v109_v41, 2 }
  0x6c   :  { %v125_v10 = vmax.f32 %v123_v37, %v124_v46  ;;  %v137_v11 = vmax.f32 %v135_v61, %v136_v42  ;;  %v60_v54 = vrot.slane %v59_v43, 1  ;;  %v49_v56 = vadd.f32 %v48_v44, %v47_v48 }
  0x6d   :  { %614 = vmatpush1.bf16.msra.mxu0 %v1006_v47  ;;  %v100_v62 = vrot.slane %v99_v51, 1  ;;  %v111_v50 = vadd.f32 %v110_v49, %v109_v41 }
  0x6e   :  { %v148_v12 = vmax.f32 %v73_v39, %v125_v10  ;;  %v150_v13 = vmax.f32 %v85_v40, %v137_v11  ;;  %v61_v52 = vadd.f32 %v60_v54, %v59_v43 }
  0x6f   :  { %v101_v53 = vadd.f32 %v100_v62, %v99_v51  ;;  %v112_v14 = vrot.slane %v111_v50, 1 }
  0x70   :  { %v290_v15 = vsel %vm289_vm0, %v150_v13, %v148_v12 }
  0x71   :  { %359 = vmatmul.mubr.f32.vlgmr.msra.gmra.mrb[0].mxu1 %v290_v15  ;;  %v113_v55 = vadd.f32 %v112_v14, %v111_v50  ;;  %v144_v16 = vadd.f32 %v101_v53, %v49_v56 }
  0x73   :  { %v146_v58 = vadd.f32 %v113_v55, %v61_v52  ;;  %v152_v59 = vmul.f32 0.0625, %v144_v16 }
  0x75   :  { %v154_v17 = vmul.f32 0.0625, %v146_v58 }
  0x77   :  { %v369_v18 = vsel %vm289_vm0, %v154_v17, %v152_v59 }
  0x78   :  { %438 = vmatmul.mubr.f32.vlgmr.msra.gmra.mrb[0].mxu0 %v369_v18 }
 0x144   :  { %v360_v28 = vpop.f32.mrb[0].mxu1 }
 0x145   :  { %v362_v29 = vpop.f32.mrb[1].mxu1 }
 0x14b   :  { %v439_v30 = vpop.f32.mrb[0].mxu0 }
 0x14c   :  { %v440_v34 = vadd.f32 %v439_v30, %v360_v28  ;;  %v441_v60 = vpop.f32.mrb[1].mxu0 }
 0x14d   :  { %v442_v0 = vadd.f32 %v441_v60, %v362_v29 }
 0x14e   :  { %v484_v1 = vmul.f32 -1.442695, %v440_v34 }
 0x14f   :  { %v485_v2 = vmul.f32 -1.442695, %v442_v0 }
 0x150   :  { %622 = vpow2.f32 %v484_v1 }
 0x151   :  { %624 = vpow2.f32 %v485_v2 }
 0x15a   :  { %v623_v19 = vpop.eup %622 }
 0x15b   :  { %v625_v20 = vpop.eup %624  ;;  %v450_v35 = vadd.f32 1.0, %v623_v19 }
 0x15c   :  { %v451_v3 = vadd.f32 1.0, %v625_v20 }
 0x15d   :  { %626 = vrcp.f32 %v450_v35 }
 0x15e   :  { %628 = vrcp.f32 %v451_v3 }
 0x167   :  { %v627_v21 = vpop.eup %626 }
 0x168   :  { %v629_v24 = vpop.eup %628 }
 0x169   :  { %v458_v25 = vcombine.low %v627_v21, %v629_v24 }
 0x16b   :  { %486 = vst.sshfl [vmem:[#allocation7] sm:$0x33 pattern:$0x76325410] %v458_v25 }
 0x16c   :  { %685 = shalt.err (!%p682_p6)
}
 0x16d   :  { %s686_s10 = scalar_lea.hbm %s989_s2, 64 }
 0x16e   :  { %p687_p7 = scmp.ne.s32.totalorder %s989_s2, %s686_s10  ;;  %p690_p8 = scmp.lt.u32.totalorder %s686_s10, %s989_s2 }
 0x170   :  { %p692_p9 = pnand %p690_p8, %p687_p7 }
 0x172   :  { %695 = shalt.err (!%p692_p9)
}
 0x173   :  { %477 = dma.vmem_to_hbm [thread:$0]  %s475_s6, 64, %s989_s2, [#allocation4]  }
 0x174   :  { %700 = dma.done.wait [#allocation4], 64  }
 0x175   :  { %701 = vsyncadd [#allocation4], 4294967232 }
 0x176   :  { %481 = vsyncpa [#allocation3], 1 }
 0x177   :  { %482 = vsyncpa [#allocation6], 1 }
 0x178   :  { %483 = vsyncpa [#allocation4], 1 }

</bundles_post_ra>
